<compile_context>
chip_gen: v5e
topology: v5e:2x2
jax: 0.10.0
libtpu: 0.0.40
codegen_flags: <defaults>
</compile_context>

<pallas_src>
import functools

import jax
import jax.numpy as jnp
from jax.experimental import pallas as pl
from jax.experimental.pallas import tpu as pltpu

HIDDEN = 64
N_CLASSES = 2
MAX_TM = 4096                 # hard cap on the row tile
VMEM_TILE_BYTES = 1 << 20     # per-stream, per-slot input tile budget (x2 streams x2 buffers)
MAX_CORE_SPLITS = 2           # leading "parallel" grid axis -> v7x megacore split
MATMUL_DTYPE = jnp.bfloat16   # hidden-layer MXU operand dtype (f32 accumulation everywhere).
                              # Set to jnp.float32 if bit-exactness vs f32 is required (v5e note).


def _round_up(x, m):
    return ((x + m - 1) // m) * m


def _cdiv(a, b):
    return (a + b - 1) // b


def _colsum_kernel(t1_ref, t2_ref, w1_ref, b1_ref, w2_ref, b2_ref, part_ref, *,
                   tm, t1_rows, t2_rows, tiles_per_core, compute_dtype):
    """Accumulate the column-sum of relu(relu(x@W1+b1)@W2+b2) over row tiles."""
    c = pl.program_id(0)            # core-split index  ("parallel")
    i = pl.program_id(1)            # row-tile index within this split ("arbitrary")
    t = c * tiles_per_core + i      # global row-tile index within each trajectory

    @pl.when(i == 0)
    def _init():
        part_ref[...] = jnp.zeros_like(part_ref)

    row_ids = jax.lax.broadcasted_iota(jnp.int32, (tm, 1), 0)

    def hidden_colsum(x_ref, n_rows):
        x = x_ref[...].astype(compute_dtype)                               # (tm, D)
        h1 = jnp.maximum(
            jnp.dot(x, w1_ref[...], preferred_element_type=jnp.float32)
            + b1_ref[...], 0.0)                                            # (tm, 64) f32
        h2 = jnp.maximum(
            jnp.dot(h1.astype(compute_dtype), w2_ref[...],
                    preferred_element_type=jnp.float32)
            + b2_ref[...], 0.0)                                            # (tm, 64) f32
        # Mask rows past the end of this trajectory (partial last tile).
        valid = n_rows - t * tm
        h2 = jnp.where(row_ids < valid, h2, 0.0)
        return jnp.sum(h2, axis=0, keepdims=True)                          # (1, 64) f32

    # Skip dead MXU work for tile slots past the end of either trajectory.
    @pl.when(t * tm < t1_rows)
    def _acc1():
        part_ref[0:1, :] += hidden_colsum(t1_ref, t1_rows)

    @pl.when(t * tm < t2_rows)
    def _acc2():
        part_ref[0:1, :] += hidden_colsum(t2_ref, t2_rows)
    # Rows 1..7 of this core's output block stay zero.


def _finalize_kernel(part_ref, w3_ref, b3_ref, out_ref, *, n_total):
    """rs = colsum(h2) @ W3 + N * b3 ; softmax over the 2 logits (runs once)."""
    colsum = jnp.sum(part_ref[...], axis=0, keepdims=True)                 # (1, 64)
    rs = jnp.dot(colsum, w3_ref[...], preferred_element_type=jnp.float32) \
        + n_total * b3_ref[...]                                            # (1, 2)
    m = jnp.max(rs, axis=-1, keepdims=True)
    e = jnp.exp(rs - m)
    out_ref[...] = e / jnp.sum(e, axis=-1, keepdims=True)


def bt_multilabel_forward(traj1, traj2, params):
    """Forward pass of BTMultiLabelModel. traj*: (T*, state_dim + action_dim)."""
    w1, b1, w2, b2, w3, b3 = params
    t1_rows, d = traj1.shape
    t2_rows, d2 = traj2.shape
    assert d == d2, "trajectories must share the feature dimension"
    n_total = t1_rows + t2_rows
    itemsize = jnp.dtype(traj1.dtype).itemsize

    # Row tile: sized so each pipelined input tile is ~VMEM_TILE_BYTES (big DMAs
    # amortise the ~0.35us per-step overhead; this kernel is HBM-stream-bound),
    # capped at MAX_TM and at the (8-rounded) longest trajectory.
    rows_cap = _round_up(max(t1_rows, t2_rows), 8)
    budget_rows = max(8, (VMEM_TILE_BYTES // max(1, d * itemsize)) // 8 * 8)
    tm = max(8, min(MAX_TM, budget_rows, rows_cap))

    n_blocks = _cdiv(max(t1_rows, t2_rows), tm)
    n_splits = max(1, min(MAX_CORE_SPLITS, n_blocks))
    tiles_per_core = _cdiv(n_blocks, n_splits)

    # bf16 matmul operands (MXU-native on v6e/v7x); biases stay f32.
    w1c = w1.astype(MATMUL_DTYPE)
    w2c = w2.astype(MATMUL_DTYPE)
    b1r = b1.reshape(1, HIDDEN).astype(jnp.float32)
    b2r = b2.reshape(1, HIDDEN).astype(jnp.float32)

    def traj_index_map(n_rows):
        # Clamp so tile slots past the end of a trajectory map to a real block
        # (the kernel skips their compute; unchanged block index -> no re-DMA).
        last = _cdiv(n_rows, tm) - 1
        return lambda c, i: (jnp.minimum(c * tiles_per_core + i, last), 0)

    const = lambda c, i: (0, 0)

    kernel = functools.partial(
        _colsum_kernel, tm=tm, t1_rows=t1_rows, t2_rows=t2_rows,
        tiles_per_core=tiles_per_core, compute_dtype=MATMUL_DTYPE)

    partials = pl.pallas_call(
        kernel,
        out_shape=jax.ShapeDtypeStruct((n_splits * 8, HIDDEN), jnp.float32),
        grid_spec=pltpu.PrefetchScalarGridSpec(
            num_scalar_prefetch=0,
            grid=(n_splits, tiles_per_core),
            in_specs=[
                pl.BlockSpec((tm, d), traj_index_map(t1_rows)),   # traj1 stream
                pl.BlockSpec((tm, d), traj_index_map(t2_rows)),   # traj2 stream
                pl.BlockSpec((d, HIDDEN), const),                 # W1 (resident)
                pl.BlockSpec((1, HIDDEN), const),                 # b1
                pl.BlockSpec((HIDDEN, HIDDEN), const),            # W2 (resident)
                pl.BlockSpec((1, HIDDEN), const),                 # b2
            ],
            out_specs=pl.BlockSpec((8, HIDDEN), lambda c, i: (c, 0)),
        ),
        compiler_params=pltpu.CompilerParams(
            dimension_semantics=("parallel", "arbitrary")),
        cost_estimate=pl.CostEstimate(
            flops=2 * n_total * (d * HIDDEN + HIDDEN * HIDDEN),
            transcendentals=0,
            bytes_accessed=n_total * d * itemsize
            + (d * HIDDEN + HIDDEN * HIDDEN) * 2 + 2 * HIDDEN * 4),
    )(traj1, traj2, w1c, b1r, w2c, b2r)

    # Tiny epilogue: combine per-core partials, layer 3 + bias + softmax, once.
    vmem = pl.BlockSpec(memory_space=pltpu.MemorySpace.VMEM)
    out = pl.pallas_call(
        functools.partial(_finalize_kernel, n_total=float(n_total)),
        out_shape=jax.ShapeDtypeStruct((1, N_CLASSES), jnp.float32),
        in_specs=[vmem, vmem, vmem],
        out_specs=vmem,
    )(partials, w3.astype(jnp.float32),
      b3.reshape(1, N_CLASSES).astype(jnp.float32))
    return out[0]                                                          # (2,)


def init_params(key, state_dim, action_dim):
    """Deterministic PyTorch-style Linear init (uniform +-1/sqrt(fan_in)).
    Weights stored as (in_features, out_features) = PyTorch W.T."""
    dims = [(state_dim + action_dim, HIDDEN), (HIDDEN, HIDDEN), (HIDDEN, N_CLASSES)]
    params = []
    for fan_in, fan_out in dims:
        key, kw, kb = jax.random.split(key, 3)
        bound = 1.0 / float(fan_in) ** 0.5
        w = jax.random.uniform(kw, (fan_in, fan_out), jnp.float32, -bound, bound)
        b = jax.random.uniform(kb, (fan_out,), jnp.float32, -bound, bound)
        params += [w, b]
    return params


def _reference_forward_f32(traj1, traj2, params):
    """Pure-JAX f32 reference (PyTorch-equivalent math)."""
    w1, b1, w2, b2, w3, b3 = params
    x = jnp.concatenate([traj1, traj2], axis=0)
    h = jax.nn.relu(x @ w1 + b1)
    h = jax.nn.relu(h @ w2 + b2)
    h = h @ w3 + b3
    return jax.nn.softmax(h.sum(axis=0))


def _reference_forward_mixed(traj1, traj2, params):
    """Reference using the same mixed precision as the kernel (bf16 MXU operands,
    f32 accumulation, layer-3 hoisted)."""
    w1, b1, w2, b2, w3, b3 = params
    x = jnp.concatenate([traj1, traj2], axis=0)
    h = jax.nn.relu(jnp.dot(x.astype(MATMUL_DTYPE), w1.astype(MATMUL_DTYPE),
                            preferred_element_type=jnp.float32) + b1)
    h = jax.nn.relu(jnp.dot(h.astype(MATMUL_DTYPE), w2.astype(MATMUL_DTYPE),
                            preferred_element_type=jnp.float32) + b2)
    rs = jnp.dot(jnp.sum(h, axis=0, keepdims=True), w3,
                 preferred_element_type=jnp.float32) + x.shape[0] * b3
    return jax.nn.softmax(rs[0])


if __name__ == "__main__":
    key = jax.random.PRNGKey(0)
    state_dim, action_dim, T = 24, 8, 8        # D = 32, 2T = 16 rows total
    kp, k1, k2 = jax.random.split(key, 3)

    params = init_params(kp, state_dim, action_dim)
    traj1 = jax.random.normal(k1, (T, state_dim + action_dim), jnp.float32)
    traj2 = jax.random.normal(k2, (T, state_dim + action_dim), jnp.float32)

    pred = bt_multilabel_forward(traj1, traj2, params)
    jax.block_until_ready(pred)

    assert pred.shape == (2,)
    assert jnp.allclose(jnp.sum(pred), 1.0, atol=1e-5)
    # Loose check vs the pure-f32 reference (bf16 operand cast changes numerics slightly).
    assert jnp.allclose(pred, _reference_forward_f32(traj1, traj2, params),
                        atol=5e-2, rtol=5e-2)
    # Tighter check vs a reference using the same mixed precision as the kernel.
    assert jnp.allclose(pred, _reference_forward_mixed(traj1, traj2, params),
                        atol=1e-2, rtol=1e-2)

    print("KERNEL_OK")
</pallas_src>

<mosaic_0001>
module attributes {stable_mosaic.version = 11 : i64} {
  func.func @_colsum_kernel(%arg0: i32, %arg1: i32, %arg2: memref<8x32xf32, #tpu.memory_space<vmem>>, %arg3: memref<8x32xf32, #tpu.memory_space<vmem>>, %arg4: memref<32x64xbf16, #tpu.memory_space<vmem>>, %arg5: memref<1x64xf32, #tpu.memory_space<vmem>>, %arg6: memref<64x64xbf16, #tpu.memory_space<vmem>>, %arg7: memref<1x64xf32, #tpu.memory_space<vmem>>, %arg8: memref<8x64xf32, #tpu.memory_space<vmem>>) attributes {dimension_semantics = [#tpu.dimension_semantics<parallel>, #tpu.dimension_semantics<arbitrary>], iteration_bounds = array<i64: 1, 1>, scalar_prefetch = 0 : i64, scratch_operands = 0 : i64, tpu.core_type = #tpu.core_type<tc>, window_params = [{transform_indices = @transform_0, window_bounds = array<i64: 8, 32>}, {transform_indices = @transform_1, window_bounds = array<i64: 8, 32>}, {pipeline_mode = #tpu.pipeline_mode<synchronous>, transform_indices = @transform_2, window_bounds = array<i64: 32, 64>}, {pipeline_mode = #tpu.pipeline_mode<synchronous>, transform_indices = @transform_3, window_bounds = array<i64: 1, 64>}, {pipeline_mode = #tpu.pipeline_mode<synchronous>, transform_indices = @transform_4, window_bounds = array<i64: 64, 64>}, {pipeline_mode = #tpu.pipeline_mode<synchronous>, transform_indices = @transform_5, window_bounds = array<i64: 1, 64>}, {transform_indices = @transform_6, window_bounds = array<i64: 8, 64>}]} {
    %c1_i32 = arith.constant 1 : i32
    %0 = arith.muli %arg0, %c1_i32 : i32
    %1 = arith.addi %0, %arg1 : i32
    %c0_i32 = arith.constant 0 : i32
    %2 = arith.cmpi eq, %arg1, %c0_i32 : i32
    %3 = arith.extui %2 : i1 to i32
    %c0_i32_0 = arith.constant 0 : i32
    %4 = arith.cmpi ne, %3, %c0_i32_0 : i32
    scf.if %4 {
      %cst = arith.constant 0.000000e+00 : f32
      %14 = vector.broadcast %cst : f32 to vector<8x64xf32>
      %c0 = arith.constant 0 : index
      %c0_6 = arith.constant 0 : index
      %15 = vector.load %arg8[%c0, %c0_6] : memref<8x64xf32, #tpu.memory_space<vmem>>, vector<8x64xf32>
      tpu.vector_store %arg8[%c0, %c0_6], %14 {strides = array<i32>} : memref<8x64xf32, #tpu.memory_space<vmem>>, vector<8x64xf32>,
    } else {
    }
    %5 = tpu.iota {dimensions = array<i32: 0>} : vector<8x1xi32>
    %c8_i32 = arith.constant 8 : i32
    %6 = arith.muli %1, %c8_i32 : i32
    %c8_i32_1 = arith.constant 8 : i32
    %7 = arith.cmpi slt, %6, %c8_i32_1 : i32
    %8 = arith.extui %7 : i1 to i32
    %c0_i32_2 = arith.constant 0 : i32
    %9 = arith.cmpi ne, %8, %c0_i32_2 : i32
    scf.if %9 {
      %c0 = arith.constant 0 : index
      %c0_6 = arith.constant 0 : index
      %14 = vector.load %arg8[%c0, %c0_6] : memref<8x64xf32, #tpu.memory_space<vmem>>, vector<1x64xf32>
      %c0_7 = arith.constant 0 : index
      %c0_8 = arith.constant 0 : index
      %15 = vector.load %arg2[%c0_7, %c0_8] : memref<8x32xf32, #tpu.memory_space<vmem>>, vector<8x32xf32>
      %16 = arith.truncf %15 : vector<8x32xf32> to vector<8x32xbf16>
      %c0_9 = arith.constant 0 : index
      %c0_10 = arith.constant 0 : index
      %17 = vector.load %arg4[%c0_9, %c0_10] : memref<32x64xbf16, #tpu.memory_space<vmem>>, vector<32x64xbf16>
      %cst = arith.constant dense<0.000000e+00> : vector<8x64xf32>
      %18 = tpu.matmul %16, %17, %cst {dimension_numbers = #tpu.dot_dimension_numbers<[1], [0], [0], [1], [0, 0, 1, 1], [], []>} : vector<8x32xbf16>, vector<32x64xbf16>, vector<8x64xf32> -> vector<8x64xf32>
      %c0_11 = arith.constant 0 : index
      %c0_12 = arith.constant 0 : index
      %19 = vector.load %arg5[%c0_11, %c0_12] : memref<1x64xf32, #tpu.memory_space<vmem>>, vector<1x64xf32>
      %20 = vector.broadcast %19 : vector<1x64xf32> to vector<8x64xf32>
      %21 = arith.addf %18, %20 : vector<8x64xf32>
      %cst_13 = arith.constant 0.000000e+00 : f32
      %22 = vector.broadcast %cst_13 : f32 to vector<8x64xf32>
      %23 = arith.maximumf %21, %22 : vector<8x64xf32>
      %24 = arith.truncf %23 : vector<8x64xf32> to vector<8x64xbf16>
      %c0_14 = arith.constant 0 : index
      %c0_15 = arith.constant 0 : index
      %25 = vector.load %arg6[%c0_14, %c0_15] : memref<64x64xbf16, #tpu.memory_space<vmem>>, vector<64x64xbf16>
      %cst_16 = arith.constant dense<0.000000e+00> : vector<8x64xf32>
      %26 = tpu.matmul %24, %25, %cst_16 {dimension_numbers = #tpu.dot_dimension_numbers<[1], [0], [0], [1], [0, 0, 1, 1], [], []>} : vector<8x64xbf16>, vector<64x64xbf16>, vector<8x64xf32> -> vector<8x64xf32>
      %c0_17 = arith.constant 0 : index
      %c0_18 = arith.constant 0 : index
      %27 = vector.load %arg7[%c0_17, %c0_18] : memref<1x64xf32, #tpu.memory_space<vmem>>, vector<1x64xf32>
      %28 = vector.broadcast %27 : vector<1x64xf32> to vector<8x64xf32>
      %29 = arith.addf %26, %28 : vector<8x64xf32>
      %cst_19 = arith.constant 0.000000e+00 : f32
      %30 = vector.broadcast %cst_19 : f32 to vector<8x64xf32>
      %31 = arith.maximumf %29, %30 : vector<8x64xf32>
      %c8_i32_20 = arith.constant 8 : i32
      %32 = arith.muli %1, %c8_i32_20 : i32
      %c8_i32_21 = arith.constant 8 : i32
      %33 = arith.subi %c8_i32_21, %32 : i32
      %34 = vector.broadcast %33 : i32 to vector<8x1xi32>
      %35 = arith.cmpi slt, %5, %34 : vector<8x1xi32>
      %cst_22 = arith.constant 0.000000e+00 : f32
      %36 = vector.shape_cast %35 : vector<8x1xi1> to vector<8x1xi1>
      %37 = vector.broadcast %36 : vector<8x1xi1> to vector<8x64xi1>
      %38 = vector.broadcast %cst_22 : f32 to vector<8x64xf32>
      %39 = arith.select %37, %31, %38 : vector<8x64xi1>, vector<8x64xf32>
      %cst_23 = arith.constant dense<0.000000e+00> : vector<64xf32>
      %40 = vector.multi_reduction <add>, %39, %cst_23 [0] : vector<8x64xf32> to vector<64xf32>
      %41 = vector.shape_cast %40 : vector<64xf32> to vector<1x64xf32>
      %42 = arith.addf %14, %41 : vector<1x64xf32>
      %c0_24 = arith.constant 0 : index
      %c0_25 = arith.constant 0 : index
      %43 = vector.load %arg8[%c0_24, %c0_25] : memref<8x64xf32, #tpu.memory_space<vmem>>, vector<1x64xf32>
      tpu.vector_store %arg8[%c0_24, %c0_25], %42 {strides = array<i32>} : memref<8x64xf32, #tpu.memory_space<vmem>>, vector<1x64xf32>,
    } else {
    }
    %c8_i32_3 = arith.constant 8 : i32
    %10 = arith.muli %1, %c8_i32_3 : i32
    %c8_i32_4 = arith.constant 8 : i32
    %11 = arith.cmpi slt, %10, %c8_i32_4 : i32
    %12 = arith.extui %11 : i1 to i32
    %c0_i32_5 = arith.constant 0 : i32
    %13 = arith.cmpi ne, %12, %c0_i32_5 : i32
    scf.if %13 {
      %c0 = arith.constant 0 : index
      %c0_6 = arith.constant 0 : index
      %14 = vector.load %arg8[%c0, %c0_6] : memref<8x64xf32, #tpu.memory_space<vmem>>, vector<1x64xf32>
      %c0_7 = arith.constant 0 : index
      %c0_8 = arith.constant 0 : index
      %15 = vector.load %arg3[%c0_7, %c0_8] : memref<8x32xf32, #tpu.memory_space<vmem>>, vector<8x32xf32>
      %16 = arith.truncf %15 : vector<8x32xf32> to vector<8x32xbf16>
      %c0_9 = arith.constant 0 : index
      %c0_10 = arith.constant 0 : index
      %17 = vector.load %arg4[%c0_9, %c0_10] : memref<32x64xbf16, #tpu.memory_space<vmem>>, vector<32x64xbf16>
      %cst = arith.constant dense<0.000000e+00> : vector<8x64xf32>
      %18 = tpu.matmul %16, %17, %cst {dimension_numbers = #tpu.dot_dimension_numbers<[1], [0], [0], [1], [0, 0, 1, 1], [], []>} : vector<8x32xbf16>, vector<32x64xbf16>, vector<8x64xf32> -> vector<8x64xf32>
      %c0_11 = arith.constant 0 : index
      %c0_12 = arith.constant 0 : index
      %19 = vector.load %arg5[%c0_11, %c0_12] : memref<1x64xf32, #tpu.memory_space<vmem>>, vector<1x64xf32>
      %20 = vector.broadcast %19 : vector<1x64xf32> to vector<8x64xf32>
      %21 = arith.addf %18, %20 : vector<8x64xf32>
      %cst_13 = arith.constant 0.000000e+00 : f32
      %22 = vector.broadcast %cst_13 : f32 to vector<8x64xf32>
      %23 = arith.maximumf %21, %22 : vector<8x64xf32>
      %24 = arith.truncf %23 : vector<8x64xf32> to vector<8x64xbf16>
      %c0_14 = arith.constant 0 : index
      %c0_15 = arith.constant 0 : index
      %25 = vector.load %arg6[%c0_14, %c0_15] : memref<64x64xbf16, #tpu.memory_space<vmem>>, vector<64x64xbf16>
      %cst_16 = arith.constant dense<0.000000e+00> : vector<8x64xf32>
      %26 = tpu.matmul %24, %25, %cst_16 {dimension_numbers = #tpu.dot_dimension_numbers<[1], [0], [0], [1], [0, 0, 1, 1], [], []>} : vector<8x64xbf16>, vector<64x64xbf16>, vector<8x64xf32> -> vector<8x64xf32>
      %c0_17 = arith.constant 0 : index
      %c0_18 = arith.constant 0 : index
      %27 = vector.load %arg7[%c0_17, %c0_18] : memref<1x64xf32, #tpu.memory_space<vmem>>, vector<1x64xf32>
      %28 = vector.broadcast %27 : vector<1x64xf32> to vector<8x64xf32>
      %29 = arith.addf %26, %28 : vector<8x64xf32>
      %cst_19 = arith.constant 0.000000e+00 : f32
      %30 = vector.broadcast %cst_19 : f32 to vector<8x64xf32>
      %31 = arith.maximumf %29, %30 : vector<8x64xf32>
      %c8_i32_20 = arith.constant 8 : i32
      %32 = arith.muli %1, %c8_i32_20 : i32
      %c8_i32_21 = arith.constant 8 : i32
      %33 = arith.subi %c8_i32_21, %32 : i32
      %34 = vector.broadcast %33 : i32 to vector<8x1xi32>
      %35 = arith.cmpi slt, %5, %34 : vector<8x1xi32>
      %cst_22 = arith.constant 0.000000e+00 : f32
      %36 = vector.shape_cast %35 : vector<8x1xi1> to vector<8x1xi1>
      %37 = vector.broadcast %36 : vector<8x1xi1> to vector<8x64xi1>
      %38 = vector.broadcast %cst_22 : f32 to vector<8x64xf32>
      %39 = arith.select %37, %31, %38 : vector<8x64xi1>, vector<8x64xf32>
      %cst_23 = arith.constant dense<0.000000e+00> : vector<64xf32>
      %40 = vector.multi_reduction <add>, %39, %cst_23 [0] : vector<8x64xf32> to vector<64xf32>
      %41 = vector.shape_cast %40 : vector<64xf32> to vector<1x64xf32>
      %42 = arith.addf %14, %41 : vector<1x64xf32>
      %c0_24 = arith.constant 0 : index
      %c0_25 = arith.constant 0 : index
      %43 = vector.load %arg8[%c0_24, %c0_25] : memref<8x64xf32, #tpu.memory_space<vmem>>, vector<1x64xf32>
      tpu.vector_store %arg8[%c0_24, %c0_25], %42 {strides = array<i32>} : memref<8x64xf32, #tpu.memory_space<vmem>>, vector<1x64xf32>,
    } else {
    }
    return
  }
  func.func @transform_0(%arg0: i32, %arg1: i32) -> (i32, i32) {
    %c1_i32 = arith.constant 1 : i32
    %0 = arith.muli %arg0, %c1_i32 : i32
    %1 = arith.addi %0, %arg1 : i32
    %c0_i32 = arith.constant 0 : i32
    %2 = arith.minsi %1, %c0_i32 : i32
    %c0_i32_0 = arith.constant 0 : i32
    %c0_i32_1 = arith.constant 0 : i32
    return %2, %c0_i32_0 : i32, i32
  }
  func.func @transform_1(%arg0: i32, %arg1: i32) -> (i32, i32) {
    %c1_i32 = arith.constant 1 : i32
    %0 = arith.muli %arg0, %c1_i32 : i32
    %1 = arith.addi %0, %arg1 : i32
    %c0_i32 = arith.constant 0 : i32
    %2 = arith.minsi %1, %c0_i32 : i32
    %c0_i32_0 = arith.constant 0 : i32
    %c0_i32_1 = arith.constant 0 : i32
    return %2, %c0_i32_0 : i32, i32
  }
  func.func @transform_2(%arg0: i32, %arg1: i32) -> (i32, i32) {
    %c0_i32 = arith.constant 0 : i32
    %c0_i32_0 = arith.constant 0 : i32
    %c0_i32_1 = arith.constant 0 : i32
    return %c0_i32, %c0_i32_0 : i32, i32
  }
  func.func @transform_3(%arg0: i32, %arg1: i32) -> (i32, i32) {
    %c0_i32 = arith.constant 0 : i32
    %c0_i32_0 = arith.constant 0 : i32
    %c0_i32_1 = arith.constant 0 : i32
    return %c0_i32, %c0_i32_0 : i32, i32
  }
  func.func @transform_4(%arg0: i32, %arg1: i32) -> (i32, i32) {
    %c0_i32 = arith.constant 0 : i32
    %c0_i32_0 = arith.constant 0 : i32
    %c0_i32_1 = arith.constant 0 : i32
    return %c0_i32, %c0_i32_0 : i32, i32
  }
  func.func @transform_5(%arg0: i32, %arg1: i32) -> (i32, i32) {
    %c0_i32 = arith.constant 0 : i32
    %c0_i32_0 = arith.constant 0 : i32
    %c0_i32_1 = arith.constant 0 : i32
    return %c0_i32, %c0_i32_0 : i32, i32
  }
  func.func @transform_6(%arg0: i32, %arg1: i32) -> (i32, i32) {
    %c0_i32 = arith.constant 0 : i32
    %c0_i32_0 = arith.constant 0 : i32
    return %arg0, %c0_i32 : i32, i32
  }
}

</mosaic_0001>

<bundles_post_ra>
// kernel: tpu_custom_call.1
= control target key start
LH: loop header
LB: loop body
LE: loop exit
PB: predicated region body
PF: predicated region fallthrough
CT: control target
= control target key end

     0   :  { %11 = vsyncpa [#allocation3], 0  ;;  %s634_s0 = inlined_call_operand.hbm [shape: f32[8,32], index: 0, kind: input, shape index: {}]   ;;  %s635_s1 = inlined_call_operand.hbm [shape: f32[8,32], index: 1, kind: input, shape index: {}]   ;;  %s636_s2 = inlined_call_operand.hbm [shape: bf16[32,64], index: 2, kind: input, shape index: {}]   ;;  %s637_s3 = inlined_call_operand.vmem [shape: f32[1,64], index: 3, kind: input, shape index: {}]   ;;  %s638_s4 = inlined_call_operand.hbm [shape: bf16[64,64], index: 4, kind: input, shape index: {}]   ;;  %s639_s5 = inlined_call_operand.vmem [shape: f32[1,64], index: 5, kind: input, shape index: {}]   ;;  %s640_s6 = inlined_call_operand.hbm [shape: f32[8,64], index: 6, kind: output, shape index: {}]  }
   0x1   :  { %12 = vsyncpa [#allocation6], 0 }
   0x2   :  { %13 = vsyncpa [#allocation9], 0  ;;  %s41_s23 = sshll.u32 %s635_s1, 4  ;;  %s42_s23 = int_to_ptr.hbm [resolvable:$true] %s41_s23 }
   0x3   :  { %14 = vsyncpa [#allocation4], 0  ;;  %s557_s24 = smov [#allocation5]   ;;  %s25_s28 = sshll.u32 %s634_s0, 4  ;;  %s26_s28 = int_to_ptr.hbm [resolvable:$true] %s25_s28 }
   0x4   :  { %s43_s25 = sshll.u32 %s557_s24, 4  ;;  %s558_s29 = smov [#allocation2]   ;;  %s44_s25 = int_to_ptr.vmem [resolvable:$true] %s43_s25 }
   0x5   :  { %46 = dma.hbm_to_vmem [thread:$0]  %s42_s23, 128, %s44_s25, [#allocation6]  }
   0x6   :  { %s27_s30 = sshll.u32 %s558_s29, 4  ;;  %s51_s9 = sshll.u32 %s636_s2, 4  ;;  %s28_s30 = int_to_ptr.vmem [resolvable:$true] %s27_s30  ;;  %s52_s9 = int_to_ptr.hbm [resolvable:$true] %s51_s9 }
   0x7   :  { %30 = dma.hbm_to_vmem [thread:$0]  %s26_s28, 128, %s28_s30, [#allocation3]  }
   0x8   :  { %s559_s1 = smov [#allocation7]   ;;  %s66_s13 = sshll.u32 %s638_s4, 4  ;;  %s67_s13 = int_to_ptr.hbm [resolvable:$true] %s66_s13 }
   0x9   :  { %s53_s10 = sshll.u32 %s559_s1, 4  ;;  %s560_s14 = smov 64   ;;  %s54_s10 = int_to_ptr.vmem [resolvable:$true] %s53_s10 }
   0xa   :  { %s561_s0 = smov 4   ;;  %s562_s15 = smov [#allocation8]  }
   0xb   :  { %59 = dma.hbm_to_vmem [thread:$0]  %s52_s9, 256, %s54_s10, [#allocation6], %s560_s14, %s560_s14, %s561_s0  }
   0xc   :  { %s68_s16 = sshll.u32 %s562_s15, 4  ;;  %s69_s16 = int_to_ptr.vmem [resolvable:$true] %s68_s16 }
   0xd   :  { %74 = dma.hbm_to_vmem [thread:$0]  %s67_s13, 512, %s69_s16, [#allocation9], %s560_s14, %s560_s14, %s561_s0  }
   0xe   :  { %549 = dma.done.wait [#allocation3], 128  }
   0xf   :  { %550 = vsyncadd [#allocation3], 4294967168 }
  0x10   :  { %551 = dma.done.wait [#allocation6], 384  }
  0x11   :  { %552 = vsyncadd [#allocation6], 4294966912 }
  0x12   :  { %553 = dma.done.wait [#allocation9], 512  }
  0x13   :  { %554 = vsyncadd [#allocation9], 4294966784  ;;  %v406_v0 = vld [vmem:[#allocation7 + $0x8] sm:$0xff]  ;;  %v405_v2 = vld [vmem:[#allocation7] sm:$0xff]  ;;  %vm137_vm0 = vcmask 261120   ;;  %vm105_vm1 = vcmask 523264  }
  0x14   :  { %v412_v1 = vld [vmem:[#allocation7 + $0x8] sm:$0xff]  ;;  %v411_v3 = vld [vmem:[#allocation7] sm:$0xff]  ;;  %v115_v4 = vld [vmem:[#allocation2] sm:$0xff]  ;;  %147 = vmatpush.bf16.msra.mxu0 %v406_v0  ;;  %v563_v28 = vmov 0.0   ;;  %vm224_vm2 = vcmask 516096   ;;  %s337_s25 = sshll.u32 %s640_s6, 4  ;;  %s338_s25 = int_to_ptr.hbm [resolvable:$true] %s337_s25 }
  0x15   :  { %258 = vmatpush.bf16.msra.mxu2 %v412_v1  ;;  %v227_v5 = vld [vmem:[#allocation5] sm:$0xff]  ;;  %v410_v6 = vld [vmem:[#allocation8 + $0x18] sm:$0xff]  ;;  %v409_v8 = vld [vmem:[#allocation8 + $0x10] sm:$0xff]  ;;  %v116_v9 = vpack.c.bf16 %v115_v4, %v115_v4  ;;  %106 = vst.msk [vmem:[#allocation10] sm:$0xff] %vm105_vm1, %v563_v28 }
  0x16   :  { %v416_v7 = vld [vmem:[#allocation8 + $0x18] sm:$0xff]  ;;  %200 = vmatpush.bf16.msra.mxu1 %v410_v6  ;;  %v228_v10 = vpack.c.bf16 %v227_v5, %v227_v5  ;;  %v408_v11 = vld [vmem:[#allocation8 + $0x8] sm:$0xff]  ;;  %v415_v12 = vld [vmem:[#allocation8 + $0x10] sm:$0xff] }
  0x17   :  { %310 = vmatpush.bf16.msra.mxu3 %v416_v7  ;;  %v407_v13 = vld [vmem:[#allocation8] sm:$0xff]  ;;  %v414_v14 = vld [vmem:[#allocation8 + $0x8] sm:$0xff] }
  0x18   :  { %148 = vmatpush.bf16.msra.mxu0 %v405_v2  ;;  %v413_v15 = vld [vmem:[#allocation8] sm:$0xff] }
  0x19   :  { %259 = vmatpush.bf16.msra.mxu2 %v411_v3  ;;  %v425_v16 = vld [vmem:[%s637_s3] ss:$0 sm:$0xff] }
  0x1a   :  { %201 = vmatpush.bf16.msra.mxu1 %v409_v8  ;;  %v426_v20 = vld [vmem:[%s637_s3] ss:$0 sm:$0xff] }
  0x1b   :  { %361 = vmatmul.msk.bf16.vlgmr.msra.gmra.mxu0 %vm137_vm0, %v116_v9  ;;  %311 = vmatpush.bf16.msra.mxu3 %v415_v12  ;;  %v427_v29 = vld [vmem:[%s639_s5] ss:$0 sm:$0xff] }
  0x1c   :  { %387 = vmatmul.msk.bf16.vlgmr.msra.gmra.mxu2 %vm137_vm0, %v228_v10  ;;  %v428_v37 = vld [vmem:[%s639_s5] ss:$0 sm:$0xff]  ;;  %s564_s5 = smov [#allocation10]  }
  0x1d   :  { %v114_v44 = vld [vmem:[#allocation10] sm:$0x1]  ;;  %s335_s22 = sshll.u32 %s564_s5, 4  ;;  %s336_s22 = int_to_ptr.vmem [resolvable:$true] %s335_s22 }
  0x1e   :  { %202 = vmatpush.bf16.msra.mxu1 %v408_v11 }
  0x1f   :  { %312 = vmatpush.bf16.msra.mxu3 %v414_v14 }
  0x22   :  { %203 = vmatpush.bf16.msra.mxu1 %v407_v13 }
  0x23   :  { %313 = vmatpush.bf16.msra.mxu3 %v413_v15 }
  0x98   :  { %v150_v17 = vpop.f32.mrf.mxu0 }
  0x99   :  { %v151_v18 = vadd.f32 %v425_v16, %v150_v17 }
  0x9b   :  { %v154_v19 = vmax.f32 %v151_v18, 0.0 }
  0x9d   :  { %v155_v21 = vpack.c.bf16 %v154_v19, %v154_v19 }
  0x9f   :  { %v261_v22 = vpop.f32.mrf.mxu2  ;;  %378 = vmatmul.msk.bf16.vlgmr.msra.gmra.mxu1 %vm105_vm1, %v155_v21 }
  0xa0   :  { %v262_v23 = vadd.f32 %v426_v20, %v261_v22  ;;  %v152_v24 = vpop.f32.mrf.mxu0 }
  0xa2   :  { %v265_v25 = vmax.f32 %v262_v23, 0.0 }
  0xa4   :  { %v266_v26 = vpack.c.bf16 %v265_v25, %v265_v25 }
  0xa6   :  { %404 = vmatmul.msk.bf16.vlgmr.msra.gmra.mxu3 %vm105_vm1, %v266_v26 }
  0xa7   :  { %v263_v27 = vpop.f32.mrf.mxu2 }
 0x11c   :  { %v205_v30 = vpop.f32.mrf.mxu1 }
 0x11d   :  { %v206_v31 = vadd.f32 %v427_v29, %v205_v30 }
 0x11f   :  { %v209_v32 = vmax.f32 %v206_v31, 0.0 }
 0x121   :  { %v216_v33 = vsel %vm105_vm1, %v209_v32, 0.0 }
 0x122   :  { %v217_v34 = vrot.slane %v216_v33, 4 }
 0x124   :  { %v218_v35 = vadd.f32 %v217_v34, %v216_v33  ;;  %v207_v36 = vpop.f32.mrf.mxu1 }
 0x126   :  { %v219_v38 = vrot.slane %v218_v35, 2 }
 0x128   :  { %v220_v39 = vadd.f32 %v219_v38, %v218_v35 }
 0x129   :  { %v315_v40 = vpop.f32.mrf.mxu3 }
 0x12a   :  { %v316_v41 = vadd.f32 %v428_v37, %v315_v40  ;;  %v221_v42 = vrot.slane %v220_v39, 1 }
 0x12c   :  { %v319_v43 = vmax.f32 %v316_v41, 0.0  ;;  %v222_v45 = vadd.f32 %v221_v42, %v220_v39 }
 0x12e   :  { %v321_v46 = vsel %vm105_vm1, %v319_v43, 0.0  ;;  %v223_v48 = vadd.f32 %v222_v45, %v114_v44 }
 0x12f   :  { %v322_v47 = vrot.slane %v321_v46, 4 }
 0x130   :  { %225 = vst.msk [vmem:[#allocation10] sm:$0x1] %vm224_vm2, %v223_v48 }
 0x131   :  { %v323_v49 = vadd.f32 %v322_v47, %v321_v46  ;;  %v317_v50 = vpop.f32.mrf.mxu3 }
 0x133   :  { %v324_v51 = vrot.slane %v323_v49, 2 }
 0x135   :  { %v325_v52 = vadd.f32 %v324_v51, %v323_v49 }
 0x137   :  { %v326_v53 = vrot.slane %v325_v52, 1  ;;  %v226_v55 = vld [vmem:[#allocation10] sm:$0x1] }
 0x139   :  { %v327_v54 = vadd.f32 %v326_v53, %v325_v52 }
 0x13b   :  { %v328_v56 = vadd.f32 %v327_v54, %v226_v55 }
 0x13d   :  { %329 = vst.msk [vmem:[#allocation10] sm:$0x1] %vm224_vm2, %v328_v56 }
 0x13e   :  { %340 = dma.vmem_to_hbm [thread:$0]  %s336_s22, 128, %s338_s25, [#allocation4]  }
 0x13f   :  { %555 = dma.done.wait [#allocation4], 128  }
 0x140   :  { %556 = vsyncadd [#allocation4], 4294967168 }
 0x141   :  { %345 = vsyncpa [#allocation3], 1 }
 0x142   :  { %346 = vsyncpa [#allocation6], 1 }
 0x143   :  { %347 = vsyncpa [#allocation9], 1 }
 0x144   :  { %348 = vsyncpa [#allocation4], 1 }

</bundles_post_ra>
